<compile_context>
chip_gen: v7x
topology: tpu7x:2x2x1
jax: 0.10.0
libtpu: 0.0.40
codegen_flags: <defaults>
</compile_context>

<pallas_src>
import math

import jax
import jax.numpy as jnp
from jax.experimental import pallas as pl
from jax.experimental.pallas import tpu as pltpu


def _round_up(n, m):
    return ((n + m - 1) // m) * m


def _gelu_tanh(x):
    # PyTorch nn.GELU(approximate='tanh') semantics (computed in f32).
    c = math.sqrt(2.0 / math.pi)
    return 0.5 * x * (1.0 + jnp.tanh(c * (x + 0.044715 * x * x * x)))


# --------------------------- kernels ----------------------------------------


def _mlp_kernel_resident(x_ref, w_fc_ref, b_fc_ref, w_proj_ref, b_proj_ref, o_ref):
    # x_ref: (tm, D); w_fc_ref: (D, H); b_fc_ref: (1, H); w_proj_ref: (H, D);
    # b_proj_ref: (1, D); o_ref: (tm, D). Weights resident across the grid.
    h = jnp.dot(x_ref[...], w_fc_ref[...], preferred_element_type=jnp.float32)
    h = h + b_fc_ref[...].astype(jnp.float32)
    h = _gelu_tanh(h)  # f32 on VPU/EUP
    out = jnp.dot(h.astype(w_proj_ref.dtype), w_proj_ref[...],
                  preferred_element_type=jnp.float32)
    o_ref[...] = (out + b_proj_ref[...].astype(jnp.float32)).astype(o_ref.dtype)


def _mlp_kernel_streamed(x_ref, w_fc_ref, b_fc_ref, w_proj_ref, b_proj_ref,
                         o_ref, acc_ref):
    # x_ref:      (tm, D)   row tile of flattened tokens
    # w_fc_ref:   (D, th)   chunk of first weight (streams over H)
    # b_fc_ref:   (1, th)   matching bias chunk
    # w_proj_ref: (th, D)   chunk of second weight
    # b_proj_ref: (1, D)    output bias (resident)
    # acc_ref:    (tm, D)   f32 accumulator, resident across the H axis
    j = pl.program_id(1)

    h = jnp.dot(x_ref[...], w_fc_ref[...], preferred_element_type=jnp.float32)
    h = h + b_fc_ref[...].astype(jnp.float32)
    h = _gelu_tanh(h)  # f32; only a (tm, th) chunk is ever live.
    partial = jnp.dot(h.astype(w_proj_ref.dtype), w_proj_ref[...],
                      preferred_element_type=jnp.float32)

    @pl.when(j == 0)
    def _():
        acc_ref[...] = partial          # no zero-init store + reload

    @pl.when(j > 0)
    def _():
        acc_ref[...] += partial

    @pl.when(j == pl.num_programs(1) - 1)
    def _():
        o_ref[...] = (acc_ref[...] +
                      b_proj_ref[...].astype(jnp.float32)).astype(o_ref.dtype)


# --------------------------- wrapper -----------------------------------------

_VMEM_BUDGET = 44 << 20            # tile-selection budget: safe on v5e/v6e/v7x
_RESIDENT_WEIGHT_BYTES = 16 << 20  # weights this small stay resident in VMEM


def mlp_pallas(x, w_fc, b_fc, w_proj, b_proj, *,
               tm=768, th_cap=512,
               max_resident_weight_bytes=_RESIDENT_WEIGHT_BYTES):
    """x: [B, T, D]; w_fc: [D, H]; b_fc: [H]; w_proj: [H, D]; b_proj: [D]."""
    B, T, D = x.shape
    H = w_fc.shape[1]
    M = B * T
    itemsize = x.dtype.itemsize

    # Sublane packing: 8 rows for f32, 16 for bf16, 32 for int8.
    sub = max(8, 32 // itemsize)
    rows = _round_up(M, sub)

    # Row tile: big tm amortizes weight HBM traffic (flops/weight-byte == tm),
    # but keep >= 2 row blocks so v7x's two TensorCores both get work.
    tm = min(tm, rows)
    tm = _round_up(tm, sub)
    if rows // tm < 2 and tm > sub:
        tm = max(sub, _round_up((rows + 1) // 2, sub))

    weight_bytes = 2 * D * H * itemsize
    resident = weight_bytes <= max_resident_weight_bytes

    # Hidden tiles: multiples of 128 that divide H (largest first), capped.
    ths = [t for t in range(128, min(th_cap, H) + 1, 128) if H % t == 0]
    ths.sort(reverse=True)
    if not resident and not ths:
        # TODO(synk): H not a multiple of 128 with weights too large for VMEM
        # would need a padded-H streamed variant; fall back to resident.
        resident = True

    def resident_footprint(tm_):
        return (4 * tm_ * D * itemsize          # x + out, double-buffered
                + 2 * weight_bytes              # w_fc + w_proj, double-buffered
                + 4 * (H + D) * itemsize)       # biases

    def streamed_footprint(tm_, th_):
        return (4 * tm_ * D * itemsize          # x + out, double-buffered
                + 4 * D * th_ * itemsize        # w_fc + w_proj chunks, dbl-buf
                + 4 * (th_ + D) * itemsize      # bias chunks
                + 4 * tm_ * D)                  # f32 accumulator scratch

    if resident:
        while resident_footprint(tm) > _VMEM_BUDGET and tm > sub:
            tm = max(sub, _round_up(tm // 2, sub))
        footprint = resident_footprint(tm)
        th = H
    else:
        th = ths[0]
        # Shrink th first (weight traffic depends only on tm), then tm.
        while streamed_footprint(tm, th) > _VMEM_BUDGET:
            smaller = [t for t in ths if t < th]
            if smaller:
                th = smaller[0]
            elif tm > sub:
                tm = max(sub, _round_up(tm // 2, sub))
            else:
                break
        footprint = streamed_footprint(tm, th)

    M_pad = _round_up(M, tm)
    n_row_blocks = M_pad // tm

    x2 = x.reshape(M, D)
    if M_pad != M:
        x2 = jnp.pad(x2, ((0, M_pad - M), (0, 0)))
    b_fc2 = b_fc.reshape(1, H)
    b_proj2 = b_proj.reshape(1, D)

    # Scoped VMEM limit sized to the real footprint (v5e default is only
    # 16 MiB); capped at 60 MiB so it also fits v7x's 64 MiB physical VMEM.
    vmem_limit = int(min(max(footprint * 5 // 4 + (4 << 20), 32 << 20), 60 << 20))

    flops = 4 * M_pad * D * H                    # two matmuls
    w_stream_bytes = (w_fc.size * w_fc.dtype.itemsize
                      + w_proj.size * w_proj.dtype.itemsize
                      + b_fc.size * b_fc.dtype.itemsize
                      + b_proj.size * b_proj.dtype.itemsize)
    if resident:
        bytes_accessed = 2 * M_pad * D * itemsize + w_stream_bytes
    else:
        bytes_accessed = 2 * M_pad * D * itemsize + n_row_blocks * w_stream_bytes
    cost = pl.CostEstimate(flops=flops, transcendentals=M_pad * H,
                           bytes_accessed=bytes_accessed)

    if resident:
        out = pl.pallas_call(
            _mlp_kernel_resident,
            out_shape=jax.ShapeDtypeStruct((M_pad, D), x.dtype),
            grid_spec=pltpu.PrefetchScalarGridSpec(
                num_scalar_prefetch=0,
                grid=(n_row_blocks,),
                in_specs=[
                    pl.BlockSpec((tm, D), lambda i: (i, 0)),   # x row tile
                    pl.BlockSpec((D, H), lambda i: (0, 0)),    # w_fc (resident)
                    pl.BlockSpec((1, H), lambda i: (0, 0)),    # b_fc
                    pl.BlockSpec((H, D), lambda i: (0, 0)),    # w_proj (resident)
                    pl.BlockSpec((1, D), lambda i: (0, 0)),    # b_proj
                ],
                out_specs=pl.BlockSpec((tm, D), lambda i: (i, 0)),
            ),
            compiler_params=pltpu.CompilerParams(
                dimension_semantics=("parallel",),
                vmem_limit_bytes=vmem_limit),
            cost_estimate=cost,
        )(x2, w_fc, b_fc2, w_proj, b_proj2)
    else:
        out = pl.pallas_call(
            _mlp_kernel_streamed,
            out_shape=jax.ShapeDtypeStruct((M_pad, D), x.dtype),
            grid_spec=pltpu.PrefetchScalarGridSpec(
                num_scalar_prefetch=0,
                grid=(n_row_blocks, H // th),
                in_specs=[
                    pl.BlockSpec((tm, D), lambda i, j: (i, 0)),   # x row tile
                    pl.BlockSpec((D, th), lambda i, j: (0, j)),   # w_fc chunk
                    pl.BlockSpec((1, th), lambda i, j: (0, j)),   # b_fc chunk
                    pl.BlockSpec((th, D), lambda i, j: (j, 0)),   # w_proj chunk
                    pl.BlockSpec((1, D), lambda i, j: (0, 0)),    # b_proj
                ],
                out_specs=pl.BlockSpec((tm, D), lambda i, j: (i, 0)),
                scratch_shapes=[pltpu.VMEM((tm, D), jnp.float32)],
            ),
            compiler_params=pltpu.CompilerParams(
                dimension_semantics=("parallel", "arbitrary"),
                vmem_limit_bytes=vmem_limit),
            cost_estimate=cost,
        )(x2, w_fc, b_fc2, w_proj, b_proj2)

    if M_pad != M:
        out = out[:M]
    return out.reshape(B, T, D)


def mlp_ref(x, w_fc, b_fc, w_proj, b_proj):
    h = x @ w_fc + b_fc
    h = _gelu_tanh(h)
    return h @ w_proj + b_proj


if __name__ == "__main__":
    key = jax.random.PRNGKey(0)

    # --- Test 1: GPTConfig-like small sizes (n_embed=32 -> hidden=128) ------
    # Weights fit in VMEM -> resident 1-D-grid path.
    B, T, D = 2, 8, 32
    H = 4 * D
    kx, k1, k2, k3, k4, key = jax.random.split(key, 6)
    x = jax.random.normal(kx, (B, T, D), dtype=jnp.float32)
    # nn.Linear(n_embed, 4*n_embed): torch weight is [H, D]; stored transposed
    # here as [D, H] so the kernel computes x @ W^T + b directly.
    w_fc = jax.random.normal(k1, (D, H), dtype=jnp.float32) * 0.02
    b_fc = jax.random.normal(k2, (H,), dtype=jnp.float32) * 0.02
    w_proj = jax.random.normal(k3, (H, D), dtype=jnp.float32) * 0.02
    b_proj = jax.random.normal(k4, (D,), dtype=jnp.float32) * 0.02

    out = jax.block_until_ready(mlp_pallas(x, w_fc, b_fc, w_proj, b_proj))
    ref = mlp_ref(x, w_fc, b_fc, w_proj, b_proj)
    assert out.shape == (B, T, D)
    assert jnp.allclose(out, ref, atol=1e-5, rtol=1e-5), "resident path mismatch"

    # --- Test 2: force the streamed (H-accumulating) path at small sizes ----
    B2, T2, D2 = 2, 8, 64
    H2 = 4 * D2
    kx, k1, k2, k3, k4, key = jax.random.split(key, 6)
    x2 = jax.random.normal(kx, (B2, T2, D2), dtype=jnp.float32)
    w_fc2 = jax.random.normal(k1, (D2, H2), dtype=jnp.float32) * 0.02
    b_fc2 = jax.random.normal(k2, (H2,), dtype=jnp.float32) * 0.02
    w_proj2 = jax.random.normal(k3, (H2, D2), dtype=jnp.float32) * 0.02
    b_proj2 = jax.random.normal(k4, (D2,), dtype=jnp.float32) * 0.02

    out2 = jax.block_until_ready(
        mlp_pallas(x2, w_fc2, b_fc2, w_proj2, b_proj2,
                   th_cap=128, max_resident_weight_bytes=0))
    ref2 = mlp_ref(x2, w_fc2, b_fc2, w_proj2, b_proj2)
    assert out2.shape == (B2, T2, D2)
    assert jnp.allclose(out2, ref2, atol=1e-5, rtol=1e-5), "streamed path mismatch"

    print("KERNEL_OK")
</pallas_src>

<mosaic_0001>
module attributes {stable_mosaic.version = 11 : i64} {
  func.func @_mlp_kernel_resident(%arg0: i32, %arg1: memref<8x32xf32, #tpu.memory_space<vmem>>, %arg2: memref<32x128xf32, #tpu.memory_space<vmem>>, %arg3: memref<1x128xf32, #tpu.memory_space<vmem>>, %arg4: memref<128x32xf32, #tpu.memory_space<vmem>>, %arg5: memref<1x32xf32, #tpu.memory_space<vmem>>, %arg6: memref<8x32xf32, #tpu.memory_space<vmem>>) attributes {dimension_semantics = [#tpu.dimension_semantics<parallel>], iteration_bounds = array<i64: 2>, scalar_prefetch = 0 : i64, scratch_operands = 0 : i64, tpu.core_type = #tpu.core_type<tc>, window_params = [{transform_indices = @transform_0, window_bounds = array<i64: 8, 32>}, {pipeline_mode = #tpu.pipeline_mode<synchronous>, transform_indices = @transform_1, window_bounds = array<i64: 32, 128>}, {pipeline_mode = #tpu.pipeline_mode<synchronous>, transform_indices = @transform_2, window_bounds = array<i64: 1, 128>}, {pipeline_mode = #tpu.pipeline_mode<synchronous>, transform_indices = @transform_3, window_bounds = array<i64: 128, 32>}, {pipeline_mode = #tpu.pipeline_mode<synchronous>, transform_indices = @transform_4, window_bounds = array<i64: 1, 32>}, {transform_indices = @transform_5, window_bounds = array<i64: 8, 32>}]} {
    %c0 = arith.constant 0 : index
    %c0_0 = arith.constant 0 : index
    %0 = vector.load %arg1[%c0, %c0_0] : memref<8x32xf32, #tpu.memory_space<vmem>>, vector<8x32xf32>
    %c0_1 = arith.constant 0 : index
    %c0_2 = arith.constant 0 : index
    %1 = vector.load %arg2[%c0_1, %c0_2] : memref<32x128xf32, #tpu.memory_space<vmem>>, vector<32x128xf32>
    %cst = arith.constant dense<0.000000e+00> : vector<8x128xf32>
    %2 = tpu.matmul %0, %1, %cst {dimension_numbers = #tpu.dot_dimension_numbers<[1], [0], [0], [1], [0, 0, 1, 1], [], []>} : vector<8x32xf32>, vector<32x128xf32>, vector<8x128xf32> -> vector<8x128xf32>
    %c0_3 = arith.constant 0 : index
    %c0_4 = arith.constant 0 : index
    %3 = vector.load %arg3[%c0_3, %c0_4] : memref<1x128xf32, #tpu.memory_space<vmem>>, vector<1x128xf32>
    %4 = vector.broadcast %3 : vector<1x128xf32> to vector<8x128xf32>
    %5 = arith.addf %2, %4 : vector<8x128xf32>
    %cst_5 = arith.constant 5.000000e-01 : f32
    %6 = vector.broadcast %cst_5 : f32 to vector<8x128xf32>
    %7 = arith.mulf %6, %5 : vector<8x128xf32>
    %cst_6 = arith.constant 4.471500e-02 : f32
    %8 = vector.broadcast %cst_6 : f32 to vector<8x128xf32>
    %9 = arith.mulf %8, %5 : vector<8x128xf32>
    %10 = arith.mulf %9, %5 : vector<8x128xf32>
    %11 = arith.mulf %10, %5 : vector<8x128xf32>
    %12 = arith.addf %5, %11 : vector<8x128xf32>
    %cst_7 = arith.constant 0.797884583 : f32
    %13 = vector.broadcast %cst_7 : f32 to vector<8x128xf32>
    %14 = arith.mulf %13, %12 : vector<8x128xf32>
    %15 = math.tanh %14 : vector<8x128xf32>
    %cst_8 = arith.constant 1.000000e+00 : f32
    %16 = vector.broadcast %cst_8 : f32 to vector<8x128xf32>
    %17 = arith.addf %16, %15 : vector<8x128xf32>
    %18 = arith.mulf %7, %17 : vector<8x128xf32>
    %c0_9 = arith.constant 0 : index
    %c0_10 = arith.constant 0 : index
    %19 = vector.load %arg4[%c0_9, %c0_10] : memref<128x32xf32, #tpu.memory_space<vmem>>, vector<128x32xf32>
    %cst_11 = arith.constant dense<0.000000e+00> : vector<8x32xf32>
    %20 = tpu.matmul %18, %19, %cst_11 {dimension_numbers = #tpu.dot_dimension_numbers<[1], [0], [0], [1], [0, 0, 1, 1], [], []>} : vector<8x128xf32>, vector<128x32xf32>, vector<8x32xf32> -> vector<8x32xf32>
    %c0_12 = arith.constant 0 : index
    %c0_13 = arith.constant 0 : index
    %21 = vector.load %arg5[%c0_12, %c0_13] : memref<1x32xf32, #tpu.memory_space<vmem>>, vector<1x32xf32>
    %22 = vector.broadcast %21 : vector<1x32xf32> to vector<8x32xf32>
    %23 = arith.addf %20, %22 : vector<8x32xf32>
    %c0_14 = arith.constant 0 : index
    %c0_15 = arith.constant 0 : index
    %24 = vector.load %arg6[%c0_14, %c0_15] : memref<8x32xf32, #tpu.memory_space<vmem>>, vector<8x32xf32>
    tpu.vector_store %arg6[%c0_14, %c0_15], %23 {strides = array<i32>} : memref<8x32xf32, #tpu.memory_space<vmem>>, vector<8x32xf32>,
    return
  }
  func.func @transform_0(%arg0: i32) -> (i32, i32) {
    %c0_i32 = arith.constant 0 : i32
    %c0_i32_0 = arith.constant 0 : i32
    return %arg0, %c0_i32 : i32, i32
  }
  func.func @transform_1(%arg0: i32) -> (i32, i32) {
    %c0_i32 = arith.constant 0 : i32
    %c0_i32_0 = arith.constant 0 : i32
    %c0_i32_1 = arith.constant 0 : i32
    return %c0_i32, %c0_i32_0 : i32, i32
  }
  func.func @transform_2(%arg0: i32) -> (i32, i32) {
    %c0_i32 = arith.constant 0 : i32
    %c0_i32_0 = arith.constant 0 : i32
    %c0_i32_1 = arith.constant 0 : i32
    return %c0_i32, %c0_i32_0 : i32, i32
  }
  func.func @transform_3(%arg0: i32) -> (i32, i32) {
    %c0_i32 = arith.constant 0 : i32
    %c0_i32_0 = arith.constant 0 : i32
    %c0_i32_1 = arith.constant 0 : i32
    return %c0_i32, %c0_i32_0 : i32, i32
  }
  func.func @transform_4(%arg0: i32) -> (i32, i32) {
    %c0_i32 = arith.constant 0 : i32
    %c0_i32_0 = arith.constant 0 : i32
    %c0_i32_1 = arith.constant 0 : i32
    return %c0_i32, %c0_i32_0 : i32, i32
  }
  func.func @transform_5(%arg0: i32) -> (i32, i32) {
    %c0_i32 = arith.constant 0 : i32
    %c0_i32_0 = arith.constant 0 : i32
    return %arg0, %c0_i32 : i32, i32
  }
}

</mosaic_0001>

<bundles_post_ra>
// kernel: tpu_custom_call.1
= control target key start
LH: loop header
LB: loop body
LE: loop exit
PB: predicated region body
PF: predicated region fallthrough
CT: control target
= control target key end

     0   :  { %10 = vsyncpa [#allocation3], 0  ;;  %s903_s0 = inlined_call_operand.vmem [shape: f32[16,32], index: 0, kind: input, shape index: {}]   ;;  %s904_s1 = inlined_call_operand.vmem [shape: f32[32,128], index: 1, kind: input, shape index: {}]   ;;  %s905_s2 = inlined_call_operand.vmem [shape: f32[1,128], index: 2, kind: input, shape index: {}]   ;;  %s906_s3 = inlined_call_operand.vmem [shape: f32[128,32], index: 3, kind: input, shape index: {}]   ;;  %s907_s4 = inlined_call_operand.vmem [shape: f32[1,32], index: 4, kind: input, shape index: {}]   ;;  %s908_s5 = inlined_call_operand.hbm [shape: f32[16,32], index: 5, kind: output, shape index: {}]  }
   0x1   :  { %12 = vsyncpa [#allocation3 + $0x1], 0  ;;  %s735_s18 = smov 0   ;;  %s737_s19 = smov 0  }
   0x2   :  { %s739_s20 = smov 0   ;;  %s741_s21 = smov 0  }
   0x3 LB: > { %s756_s22 = sadd.s32 4294967295, %s699_s21   ;;  %s482_s23 = sadd.s32 4294967294, %s699_s21   ;;  %s699_s21 = sphi %s741_s21, %s914_s21   ;;  %s695_s20 = sphi %s739_s20, %s913_s20   ;;  %s691_s19 = sphi %s737_s19, %s912_s19   ;;  %s687_s18 = sphi %s735_s18, %s911_s18  }
   0x4   : > { %s760_s24 = sadd.s32 1, %s699_s21   ;;  %s135_s25 = sadd.s32 1, %s695_s20 }
   0x5   : > { %s132_s26 = ssub.s32 %s699_s21, %s760_s24  ;;  %p145_p0 = scmp.ne.s32.totalorder %s695_s20, %s691_s19 }
   0x6   : > { %p133_p1 = scmp.eq.s32.totalorder %s132_s26, 0  ;;  %p146_p2 = scmp.eq.s32.totalorder %s756_s22, 1 }
   0x7   : > { %p151_p3 = scmp.ne.s32.totalorder %s691_s19, %s687_s18  ;;  %p152_p4 = scmp.eq.s32.totalorder %s482_s23, 1 }
   0x8   : > { %s771_s27 = scalar_select %p133_p1, %s695_s20, %s135_s25  }
   0x9   : > { %p773_p5 = por %p146_p2, %p145_p0  ;;  %p777_p6 = por %p152_p4, %p151_p3 }
   0xa   : > { %p485_p7 = scmp.ge.s32.totalorder %s699_s21, 1  ;;  %p189_p8 = scmp.lt.s32.totalorder %s699_s21, 3 }
   0xc   : > { %p190_p9 = pnand %p485_p7, %p189_p8 }
   0xd   : > { %v221_v0 = vld [vmem:[%s904_s1] sm:$0xff] (!%p190_p9)  ;;  %v222_v1 = vld [vmem:[%s904_s1 + $0x8] sm:$0xff] (!%p190_p9)  ;;  %v223_v2 = vld [vmem:[%s904_s1 + $0x10] sm:$0xff] (!%p190_p9)  ;;  %v701_v3 = vmov (!%p190_p9), 0.0|0.0   ;;  %vm702_vm0 = vmmov (!%p190_p9), 0   ;;  %v703_v6 = vmov (!%p190_p9), 0.0  }
   0xe   : > { %193 = sbr.rel (%p190_p9) target bundleno = 493 (0x1ed), region = 40  ;;  %563 = vmatprep.subr.bf16.mxu0 (!%p190_p9), %v701_v3  ;;  %v564_v4 = vpack.c.bf16 (!%p190_p9), %v222_v1, %v221_v0  ;;  %v224_v5 = vld [vmem:[%s904_s1 + $0x18] sm:$0xff] (!%p190_p9)  ;;  %525 = vmatprep.mubr.msk.f32.mxu0 (!%p190_p9), %vm702_vm0, %v703_v6  ;;  %p216_p10 = scmp.lt.s32.totalorder (!%p190_p9), %s756_s22, 1  ;;  %v315_v7 = vld [vmem:[%s906_s3] sm:$0xff] (!%p190_p9)  ;;  %v316_v8 = vld [vmem:[%s906_s3 + $0x8] sm:$0xff] (!%p190_p9)  ;;  %vm232_vm1 = vcmask (!%p190_p9), 261120  }
   0xf   : > { %569 = vmatprep.subr.bf16.mxu1 (!%p190_p9), %v701_v3  ;;  %v570_v9 = vpack.c.bf16 (!%p190_p9), %v316_v8, %v315_v7  ;;  %560 = vmatprep.mubr.msk.f32.mxu1 (!%p190_p9), %vm702_vm0, %v703_v6  ;;  %v567_v10 = vpack.c.bf16 (!%p190_p9), %v224_v5, %v223_v2  ;;  %v317_v12 = vld [vmem:[%s906_s3 + $0x10] sm:$0xff] (!%p190_p9)  ;;  %v318_v13 = vld [vmem:[%s906_s3 + $0x18] sm:$0xff] (!%p190_p9)  ;;  %v319_v15 = vld [vmem:[%s906_s3 + $0x20] sm:$0xff] (!%p190_p9)  ;;  %s213_s26 = sand.u32 (!%p190_p9), 1, %s691_s19   ;;  %s492_s8 = sshll.u32 (!%p190_p9), %s756_s22, 7 }
  0x10   : > { %565 = vmatpush3.bf16.msra.mxu0 (!%p190_p9), %v564_v4  ;;  %v573_v14 = vpack.c.bf16 (!%p190_p9), %v318_v13, %v317_v12  ;;  %v320_v16 = vld [vmem:[%s906_s3 + $0x28] sm:$0xff] (!%p190_p9)  ;;  %v321_v18 = vld [vmem:[%s906_s3 + $0x30] sm:$0xff] (!%p190_p9)  ;;  %v322_v19 = vld [vmem:[%s906_s3 + $0x38] sm:$0xff] (!%p190_p9)  ;;  %s860_s13 = scalar_lea.hbm (!%p190_p9), %s908_s5, %s492_s8  ;;  %s410_s14 = scalar_lea.sflag (!%p190_p9), [#allocation3], %s213_s26 }
  0x11   : > { %566 = vmatprep.subr.bf16.mxu0 (!%p190_p9), %v701_v3  ;;  %571 = vmatpush3.bf16.msra.mxu1 (!%p190_p9), %v570_v9  ;;  %v576_v17 = vpack.c.bf16 (!%p190_p9), %v320_v16, %v319_v15  ;;  %v579_v20 = vpack.c.bf16 (!%p190_p9), %v322_v19, %v321_v18  ;;  %v323_v21 = vld [vmem:[%s906_s3 + $0x40] sm:$0xff] (!%p190_p9)  ;;  %v324_v22 = vld [vmem:[%s906_s3 + $0x48] sm:$0xff] (!%p190_p9)  ;;  %v325_v24 = vld [vmem:[%s906_s3 + $0x50] sm:$0xff] (!%p190_p9) }
  0x12   : > { %572 = vmatprep.subr.bf16.mxu1 (!%p190_p9), %v701_v3  ;;  %v582_v23 = vpack.c.bf16 (!%p190_p9), %v324_v22, %v323_v21  ;;  %v326_v25 = vld [vmem:[%s906_s3 + $0x58] sm:$0xff] (!%p190_p9)  ;;  %v327_v27 = vld [vmem:[%s906_s3 + $0x60] sm:$0xff] (!%p190_p9)  ;;  %v328_v28 = vld [vmem:[%s906_s3 + $0x68] sm:$0xff] (!%p190_p9) }
  0x13   : > { %v585_v26 = vpack.c.bf16 (!%p190_p9), %v326_v25, %v325_v24  ;;  %v588_v29 = vpack.c.bf16 (!%p190_p9), %v328_v28, %v327_v27  ;;  %v329_v30 = vld [vmem:[%s906_s3 + $0x70] sm:$0xff] (!%p190_p9)  ;;  %v330_v31 = vld [vmem:[%s906_s3 + $0x78] sm:$0xff] (!%p190_p9)  ;;  %v488_v33 = vld [vmem:[%s905_s2] ss:$0 sm:$0xff] (!%p190_p9) }
  0x14   : > { %568 = vmatpush3.bf16.msra.mxu0 (!%p190_p9), %v567_v10  ;;  %v591_v32 = vpack.c.bf16 (!%p190_p9), %v330_v31, %v329_v30  ;;  %v490_v46 = vld [vmem:[%s907_s4] ss:$0 sm:$0xff] (!%p190_p9) }
  0x15   : > { %s217_s17 = scalar_select %p216_p10, %s756_s22, 1  ;;  %574 = vmatpush3.bf16.msra.mxu1 %v573_v14 }
  0x16   : > { %575 = vmatprep.subr.bf16.mxu1 %v701_v3  ;;  %s704_s22 = smov [#allocation2]  }
  0x17   : > { %s487_s23 = sshll.u32 %s217_s17, 3  ;;  %s641_s16 = sshll.u32 %s704_s22, 4  ;;  %s642_s16 = int_to_ptr.vmem [resolvable:$false] %s641_s16 }
  0x18   : > { %s219_s30 = scalar_lea.vmem %s903_s0, %s487_s23  ;;  %s643_s17 = scalar_lea.vmem %s642_s16, 256 }
  0x19   : > { %v220_v11 = vld [vmem:[%s219_s30] sm:$0xff]  ;;  %577 = vmatpush3.bf16.msra.mxu1 %v576_v17  ;;  %s486_s30 = sshll.u32 %s213_s26, 3 }
  0x1a   : > { %526 = vmatmul.mubr.msk.f32.vlgmr.msra.gmra.mrb[0].mxu0 %vm232_vm1, %v220_v11  ;;  %578 = vmatprep.subr.bf16.mxu1 %v701_v3  ;;  %s215_s9 = scalar_lea.vmem [#allocation2], %s486_s30 }
  0x1b   : > { %s423_s10 = sshll.u32 %s215_s9, 4  ;;  %s862_s10 = int_to_ptr.vmem [resolvable:$true] %s423_s10 }
  0x1c   : > { %s637_s15 = scalar_lea.vmem %s862_s10, 128  ;;  %p644_p0 = scmp.lt.s32.totalorder %s862_s10, %s642_s16 }
  0x1d   : > { %580 = vmatpush3.bf16.msra.mxu1 %v579_v20  ;;  %p638_p11 = scmp.ne.s32.totalorder %s862_s10, %s637_s15  ;;  %p645_p1 = scmp.lt.s32.totalorder %s643_s17, %s637_s15 }
  0x1e   : > { %581 = vmatprep.subr.bf16.mxu1 %v701_v3 }
  0x1f   : > { %p639_p12 = pnand %p638_p11, %p773_p5  ;;  %p646_p2 = por %p645_p1, %p644_p0 }
  0x21   : > { %583 = vmatpush3.bf16.msra.mxu1 %v582_v23  ;;  %p640_p13 = pneg %p639_p12 }
  0x22   : > { %584 = vmatprep.subr.bf16.mxu1 %v701_v3 }
  0x23   : > { %p647_p3 = pnand %p646_p2, %p640_p13 }
  0x25   : > { %586 = vmatpush3.bf16.msra.mxu1 %v585_v26 }
  0x26   : > { %587 = vmatprep.subr.bf16.mxu1 %v701_v3 }
  0x29   : > { %589 = vmatpush3.bf16.msra.mxu1 %v588_v29 }
  0x2a   : > { %590 = vmatprep.subr.bf16.mxu1 %v701_v3 }
  0x2d   : > { %592 = vmatpush3.bf16.msra.mxu1 %v591_v32 }
  0xed   : > { %v302_v34 = vpop.f32.mrb[0].mxu0 }
  0xee   : > { %v303_v35 = vadd.f32 %v488_v33, %v302_v34  ;;  %v527_v36 = vpop.f32.mrb[1].mxu0 }
  0xf0   : > { %v307_v37 = vmul.f32 0.044715, %v303_v35  ;;  %v306_v43 = vmul.f32 0.5, %v303_v35 }
  0xf2   : > { %v308_v38 = vmul.f32 %v307_v37, %v303_v35 }
  0xf4   : > { %v309_v39 = vmul.f32 %v308_v38, %v303_v35 }
  0xf6   : > { %v310_v40 = vadd.f32 %v309_v39, %v303_v35 }
  0xf8   : > { %v311_v41 = vmul.f32 0.7978846, %v310_v40 }
  0xfa   : > { %635 = vtanh.f32 %v311_v41 }
 0x104   : > { %v636_v42 = vpop.eup %635 }
 0x105   : > { %v313_v44 = vadd.f32 1.0, %v636_v42 }
 0x107   : > { %v314_v45 = vmul.f32 %v313_v44, %v306_v43 }
 0x109   : > { %561 = vmatmul.mubr.f32.vlgmr.msra.gmra.mrb[0].mxu1 %v314_v45 }
 0x1dc   : > { %v404_v47 = vpop.f32.mrb[0].mxu1 }
 0x1dd   : > { %v405_v48 = vadd.f32 %v490_v46, %v404_v47  ;;  %v562_v49 = vpop.f32.mrb[1].mxu1 }
 0x1df   : > { %408 = vst.msk [vmem:[%s215_s9] sm:$0xff] %vm232_vm1, %v405_v48 }
 0x1e0   : > { %650 = shalt.err (!%p647_p3)
}
 0x1e1   : > { %s651_s23 = scalar_lea.hbm %s860_s13, 128  ;;  %s655_s30 = scalar_lea.hbm %s908_s5, 256 }
 0x1e2   : > { %p652_p4 = scmp.ne.s32.totalorder %s860_s13, %s651_s23  ;;  %p656_p9 = scmp.lt.u32.totalorder %s860_s13, %s908_s5 }
 0x1e3   : > { %p657_p10 = scmp.lt.u32.totalorder %s655_s30, %s651_s23  ;;  %p659_p12 = scmp.lt.u32.totalorder %s651_s23, %s860_s13 }
 0x1e4   : > { %p653_p7 = pnand %p652_p4, %p773_p5 }
 0x1e5   : > { %p658_p11 = por %p657_p10, %p656_p9 }
 0x1e6   : > { %p654_p8 = pneg %p653_p7 }
 0x1e7   : > { %p660_p13 = por %p659_p12, %p658_p11 }
 0x1e9   : > { %p661_p0 = pnand %p660_p13, %p654_p8 }
 0x1eb   : > { %664 = shalt.err (!%p661_p0)
}
 0x1ec   : > { %593 = dma.vmem_to_hbm [thread:$0]  (%p773_p5), %s862_s10, 128, %s860_s13, %s410_s14  }
 0x1ed PF: > { %p599_p1 = scmp.ge.s32.totalorder %s699_s21, 2  ;;  %s435_s8 = sand.u32 1, %s687_s18  }
 0x1ee   : > { %s436_s9 = scalar_lea.sflag [#allocation3], %s435_s8 }
 0x1ef   : > { %p596_p2 = pnand %p599_p1, %p777_p6 }
 0x1f1   : > { %682 = dma.done.wait (!%p596_p2), %s436_s9, 128  }
 0x1f2   : > { %684 = vsyncadd (!%p596_p2), %s436_s9, 4294967168  ;;  %p15_p3 = scmp.ge.s32.totalorder %s760_s24, 4   ;;  %s911_s18 = smov %s691_s19 }
 0x1f3   : > { %s912_s19 = smov %s695_s20  ;;  %s913_s20 = smov %s771_s27 }
 0x1f4   : > { %s914_s21 = smov %s760_s24  ;;  %17 = sbr.rel (!%p15_p3) target bundleno = 3 (0x3), region = 75 }
 0x1fb   :  { %441 = vsyncpa [#allocation3], 1 }
 0x1fc   :  { %443 = vsyncpa [#allocation3 + $0x1], 1 }

</bundles_post_ra>
